<compile_context>
chip_gen: v7x
topology: tpu7x:2x2x1
jax: 0.10.0
libtpu: 0.0.40
codegen_flags: <defaults>
</compile_context>

<pallas_src>
import jax
import jax.numpy as jnp
from jax.experimental import pallas as pl
from jax.experimental.pallas import tpu as pltpu

DIN = 10          # dout in the PyTorch module (Linear input features)
DOUT = 100        # num_h3 in the PyTorch module (Linear output features)
DOUT_PAD = 128    # lane-dense MXU N-dim for the weight/bias (multiple of 128)
TM_MAX = 8192     # batch-tile rows; ~16 MiB double-buffered in+out in VMEM
VMEM_LIMIT_BYTES = 40 << 20  # explicit scoped-VMEM limit, safe on v5e/v6e/v7x


def _round_up(x, m):
    return (x + m - 1) // m * m


def _linear_relu_kernel(x_ref, wt_ref, b_ref, o_ref):
    # x_ref : [TM, DIN]        (VMEM)
    # wt_ref: [DIN, DOUT_PAD]  (VMEM)  -- transposed, zero-padded Linear weight
    # b_ref : [1, DOUT_PAD]    (VMEM)  -- zero-padded bias
    # o_ref : [TM, DOUT]       (VMEM)  -- unpadded 100-column output tile
    y = jnp.dot(x_ref[...], wt_ref[...],
                preferred_element_type=jnp.float32,
                precision=jax.lax.Precision.HIGHEST)
    y = jnp.maximum(y + b_ref[...], 0.0)
    o_ref[...] = y[:, :DOUT]


def prepare_params(weight, bias):
    """One-time prep (hoisted out of the hot path): transpose the nn.Linear
    weight to [DIN, DOUT] and zero-pad the feature axis to 128 so the MXU
    N-dim is clean. Zero padding keeps the padded columns at relu(0+0)=0; the
    kernel never stores them anyway."""
    wt_pad = jnp.zeros((DIN, DOUT_PAD), jnp.float32).at[:, :DOUT].set(
        jnp.transpose(weight).astype(jnp.float32))
    b_pad = jnp.zeros((1, DOUT_PAD), jnp.float32).at[:, :DOUT].set(
        jnp.reshape(bias, (1, DOUT)).astype(jnp.float32))
    return wt_pad, b_pad


def backward_dout_h3_forward(x, wt_pad, b_pad, *, tm=None):
    """x: any shape whose total size is a multiple of DIN.
    wt_pad/b_pad: output of prepare_params(). Returns [N, DOUT] float32."""
    x2d = jnp.reshape(x, (-1, DIN)).astype(jnp.float32)   # x.view(-1, 10).float()
    n = x2d.shape[0]

    # Row-tile size: multiple of 8 (sublane constraint), capped for VMEM.
    if tm is None:
        tm = min(TM_MAX, _round_up(n, 8))
    tm = max(8, _round_up(tm, 8))

    # No row padding: Pallas masks the ragged final tile (block rows are a
    # multiple of 8; the feature dims equal the full array dims).
    grid = (pl.cdiv(n, tm),)

    out = pl.pallas_call(
        _linear_relu_kernel,
        out_shape=jax.ShapeDtypeStruct((n, DOUT), jnp.float32),
        grid_spec=pltpu.PrefetchScalarGridSpec(
            num_scalar_prefetch=0,
            grid=grid,
            in_specs=[
                pl.BlockSpec((tm, DIN), lambda i: (i, 0)),
                pl.BlockSpec((DIN, DOUT_PAD), lambda i: (0, 0)),
                pl.BlockSpec((1, DOUT_PAD), lambda i: (0, 0)),
            ],
            out_specs=pl.BlockSpec((tm, DOUT), lambda i: (i, 0)),
        ),
        compiler_params=pltpu.CompilerParams(
            dimension_semantics=("parallel",),
            vmem_limit_bytes=VMEM_LIMIT_BYTES),
    )(x2d, wt_pad, b_pad)

    return out  # exact module semantics: [N, 100] float32, no post-slice


def init_params(key):
    # Deterministic init mimicking nn.Linear's uniform(-1/sqrt(fan_in), +)
    kw, kb = jax.random.split(key)
    bound = 1.0 / jnp.sqrt(jnp.float32(DIN))
    weight = jax.random.uniform(kw, (DOUT, DIN), jnp.float32, -bound, bound)
    bias = jax.random.uniform(kb, (DOUT,), jnp.float32, -bound, bound)
    return weight, bias


if __name__ == "__main__":
    key = jax.random.PRNGKey(0)
    kx, kx2, kx3, kp = jax.random.split(key, 4)

    weight, bias = init_params(kp)
    wt_pad, b_pad = prepare_params(weight, bias)   # hoisted out of the hot path

    def ref_fn(xin):
        return jnp.maximum(jnp.reshape(xin, (-1, DIN)) @ weight.T + bias, 0.0)

    # Case 1: small input, flattens to (8, 10) -> single exact tile.
    x = jax.random.normal(kx, (2, 4, DIN), jnp.float32)
    out = jax.block_until_ready(backward_dout_h3_forward(x, wt_pad, b_pad))
    assert out.shape == (8, DOUT)
    assert jnp.allclose(out, ref_fn(x), atol=1e-5, rtol=1e-5)

    # Case 2: N=20 with a tiny forced tile (tm=8) to exercise the multi-tile
    # pipelined path with a ragged (masked) final tile.
    x2 = jax.random.normal(kx2, (10, 2, DIN), jnp.float32)
    out2 = jax.block_until_ready(
        backward_dout_h3_forward(x2, wt_pad, b_pad, tm=8))
    assert out2.shape == (20, DOUT)
    assert jnp.allclose(out2, ref_fn(x2), atol=1e-5, rtol=1e-5)

    # Case 3: N=3 (not a multiple of 8) -> single partial tile, masked rows
    # on both the input load and the output store.
    x3 = jax.random.normal(kx3, (3, DIN), jnp.float32)
    out3 = jax.block_until_ready(backward_dout_h3_forward(x3, wt_pad, b_pad))
    assert out3.shape == (3, DOUT)
    assert jnp.allclose(out3, ref_fn(x3), atol=1e-5, rtol=1e-5)

    print("KERNEL_OK")
</pallas_src>

<mosaic_0001>
module attributes {stable_mosaic.version = 11 : i64} {
  func.func @_linear_relu_kernel(%arg0: i32, %arg1: memref<8x10xf32, #tpu.memory_space<vmem>>, %arg2: memref<10x128xf32, #tpu.memory_space<vmem>>, %arg3: memref<1x128xf32, #tpu.memory_space<vmem>>, %arg4: memref<8x100xf32, #tpu.memory_space<vmem>>) attributes {dimension_semantics = [#tpu.dimension_semantics<parallel>], iteration_bounds = array<i64: 1>, scalar_prefetch = 0 : i64, scratch_operands = 0 : i64, tpu.core_type = #tpu.core_type<tc>, window_params = [{transform_indices = @transform_0, window_bounds = array<i64: 8, 10>}, {pipeline_mode = #tpu.pipeline_mode<synchronous>, transform_indices = @transform_1, window_bounds = array<i64: 10, 128>}, {pipeline_mode = #tpu.pipeline_mode<synchronous>, transform_indices = @transform_2, window_bounds = array<i64: 1, 128>}, {transform_indices = @transform_3, window_bounds = array<i64: 8, 100>}]} {
    %c0 = arith.constant 0 : index
    %c0_0 = arith.constant 0 : index
    %0 = vector.load %arg1[%c0, %c0_0] : memref<8x10xf32, #tpu.memory_space<vmem>>, vector<8x10xf32>
    %c0_1 = arith.constant 0 : index
    %c0_2 = arith.constant 0 : index
    %1 = vector.load %arg2[%c0_1, %c0_2] : memref<10x128xf32, #tpu.memory_space<vmem>>, vector<10x128xf32>
    %cst = arith.constant dense<0.000000e+00> : vector<8x128xf32>
    %2 = tpu.matmul %0, %1, %cst {dimension_numbers = #tpu.dot_dimension_numbers<[1], [0], [0], [1], [0, 0, 1, 1], [], []>, precision = #tpu.contract_precision<fp32>} : vector<8x10xf32>, vector<10x128xf32>, vector<8x128xf32> -> vector<8x128xf32>
    %c0_3 = arith.constant 0 : index
    %c0_4 = arith.constant 0 : index
    %3 = vector.load %arg3[%c0_3, %c0_4] : memref<1x128xf32, #tpu.memory_space<vmem>>, vector<1x128xf32>
    %4 = vector.broadcast %3 : vector<1x128xf32> to vector<8x128xf32>
    %5 = arith.addf %2, %4 : vector<8x128xf32>
    %cst_5 = arith.constant 0.000000e+00 : f32
    %6 = vector.broadcast %cst_5 : f32 to vector<8x128xf32>
    %7 = arith.maximumf %5, %6 : vector<8x128xf32>
    %8 = vector.extract_strided_slice %7 {offsets = [0, 0], sizes = [8, 100], strides = [1, 1]} : vector<8x128xf32> to vector<8x100xf32>
    %c0_6 = arith.constant 0 : index
    %c0_7 = arith.constant 0 : index
    %9 = vector.load %arg4[%c0_6, %c0_7] : memref<8x100xf32, #tpu.memory_space<vmem>>, vector<8x100xf32>
    tpu.vector_store %arg4[%c0_6, %c0_7], %8 {strides = array<i32>} : memref<8x100xf32, #tpu.memory_space<vmem>>, vector<8x100xf32>,
    return
  }
  func.func @transform_0(%arg0: i32) -> (i32, i32) {
    %c0_i32 = arith.constant 0 : i32
    %c0_i32_0 = arith.constant 0 : i32
    return %arg0, %c0_i32 : i32, i32
  }
  func.func @transform_1(%arg0: i32) -> (i32, i32) {
    %c0_i32 = arith.constant 0 : i32
    %c0_i32_0 = arith.constant 0 : i32
    %c0_i32_1 = arith.constant 0 : i32
    return %c0_i32, %c0_i32_0 : i32, i32
  }
  func.func @transform_2(%arg0: i32) -> (i32, i32) {
    %c0_i32 = arith.constant 0 : i32
    %c0_i32_0 = arith.constant 0 : i32
    %c0_i32_1 = arith.constant 0 : i32
    return %c0_i32, %c0_i32_0 : i32, i32
  }
  func.func @transform_3(%arg0: i32) -> (i32, i32) {
    %c0_i32 = arith.constant 0 : i32
    %c0_i32_0 = arith.constant 0 : i32
    return %arg0, %c0_i32 : i32, i32
  }
}

</mosaic_0001>

<bundles_post_ra>
// kernel: tpu_custom_call.1
= control target key start
LH: loop header
LB: loop body
LE: loop exit
PB: predicated region body
PF: predicated region fallthrough
CT: control target
= control target key end

     0   :  { %8 = vsyncpa [#allocation3], 0  ;;  %s786_s0 = inlined_call_operand.hbm [shape: f32[8,10], index: 0, kind: input, shape index: {}]   ;;  %s787_s1 = inlined_call_operand.hbm [shape: f32[10,128], index: 1, kind: input, shape index: {}]   ;;  %s788_s2 = inlined_call_operand.vmem [shape: f32[1,128], index: 2, kind: input, shape index: {}]   ;;  %s789_s3 = inlined_call_operand.hbm [shape: f32[8,100], index: 3, kind: output, shape index: {}]  }
   0x1   :  { %9 = vsyncpa [#allocation6], 0 }
   0x2   :  { %10 = vsyncpa [#allocation4], 0  ;;  %s706_s12 = smov [#allocation2]   ;;  %s707_s14 = smov [#allocation5]  }
   0x3   :  { %s17_s13 = sshll.u32 %s706_s12, 4  ;;  %s26_s15 = sshll.u32 %s707_s14, 4  ;;  %s18_s13 = int_to_ptr.vmem [resolvable:$true] %s17_s13  ;;  %s734_s15 = int_to_ptr.vmem [resolvable:$true] %s26_s15 }
   0x4   :  { %s634_s18 = scalar_lea.hbm %s786_s0, 128 }
   0x5   :  { %p635_p0 = scmp.ne.s32.totalorder %s786_s0, %s634_s18  ;;  %p638_p1 = scmp.lt.u32.totalorder %s634_s18, %s786_s0 }
   0x7   :  { %p640_p2 = pnand %p638_p1, %p635_p0 }
   0x9   :  { %643 = shalt.err (!%p640_p2)
}
   0xa   :  { %s644_s23 = scalar_lea.vmem %s18_s13, 128  ;;  %p649_p4 = scmp.lt.s32.totalorder %s18_s13, %s18_s13 }
   0xb   :  { %p645_p3 = scmp.ne.s32.totalorder %s18_s13, %s644_s23  ;;  %p650_p5 = scmp.lt.s32.totalorder %s644_s23, %s644_s23 }
   0xd   :  { %p651_p6 = por %p650_p5, %p649_p4 }
   0xf   :  { %p652_p7 = pnand %p651_p6, %p645_p3 }
  0x11   :  { %655 = shalt.err (!%p652_p7)
}
  0x12   :  { %20 = dma.hbm_to_vmem [thread:$0]  %s786_s0, 128, %s18_s13, [#allocation3]  }
  0x13   :  { %s656_s28 = scalar_lea.hbm %s787_s1, 256 }
  0x14   :  { %p657_p8 = scmp.ne.s32.totalorder %s787_s1, %s656_s28  ;;  %p660_p9 = scmp.lt.u32.totalorder %s656_s28, %s787_s1 }
  0x16   :  { %p662_p10 = pnand %p660_p9, %p657_p8 }
  0x18   :  { %665 = shalt.err (!%p662_p10)
}
  0x19   :  { %s666_s6 = scalar_lea.vmem %s734_s15, 256  ;;  %p671_p12 = scmp.lt.s32.totalorder %s734_s15, %s734_s15 }
  0x1a   :  { %p667_p11 = scmp.ne.s32.totalorder %s734_s15, %s666_s6  ;;  %p672_p13 = scmp.lt.s32.totalorder %s666_s6, %s666_s6 }
  0x1c   :  { %p673_p0 = por %p672_p13, %p671_p12 }
  0x1e   :  { %p674_p1 = pnand %p673_p0, %p667_p11 }
  0x20   :  { %677 = shalt.err (!%p674_p1)
}
  0x21   :  { %s708_s0 = smov 128   ;;  %s709_s7 = smov 8  }
  0x22   :  { %32 = dma.hbm_to_vmem [thread:$0]  %s787_s1, 256, %s734_s15, [#allocation6], %s708_s0, %s708_s0, %s709_s7  }
  0x23   :  { %700 = dma.done.wait [#allocation3], 128  }
  0x24   :  { %701 = vsyncadd [#allocation3], 4294967168 }
  0x25   :  { %702 = dma.done.wait [#allocation6], 256  }
  0x26   :  { %703 = vsyncadd [#allocation6], 4294967040  ;;  %v710_v0 = vmov 0.0|0.0   ;;  %vm711_vm0 = vmmov 0   ;;  %v712_v1 = vmov 0.0   ;;  %vm55_vm1 = vcmask 1041408  }
  0x27   :  { %607 = vmatprep.subr.bf16.mxu0 %v710_v0  ;;  %598 = vmatprep.subr.bf16.mxu1 %v710_v0  ;;  %vm51_vm2 = vcmask 80896   ;;  %v42_v2 = vld [vmem:[#allocation5] sm:$0xff]  ;;  %v43_v3 = vld [vmem:[#allocation5 + $0x8] sm:$0x3]  ;;  %v41_v4 = vld [vmem:[#allocation2] sm:$0xff]  ;;  %s713_s11 = smov [#allocation7]  }
  0x28   :  { %581 = vmatprep.mubr.msk.f32.mxu0 %vm711_vm0, %v712_v1  ;;  %560 = vmatprep.mubr.msk.f32.mxu1 %vm711_vm0, %v712_v1  ;;  %v57_v5 = vsel %vm55_vm1, %v43_v3, 0  ;;  %v60_v6 = vand.u32 4294901760, %v42_v2  ;;  %v53_v7 = vsel %vm51_vm2, %v41_v4, 0  ;;  %v537_v28 = vld [vmem:[%s788_s2] ss:$0 sm:$0xff]  ;;  %s527_s12 = sshll.u32 %s713_s11, 4  ;;  %s528_s12 = int_to_ptr.vmem [resolvable:$true] %s527_s12 }
  0x29   :  { %v63_v8 = vand.u32 4294901760, %v57_v5  ;;  %v126_v9 = vand.u32 4294901760, %v53_v7  ;;  %vm519_vm3 = vcmask 818176   ;;  %s678_s13 = scalar_lea.vmem %s528_s12, 128  ;;  %p683_p3 = scmp.lt.s32.totalorder %s528_s12, %s528_s12 }
  0x2a   :  { %v138_v10 = vsub.f32 %v42_v2, %v60_v6  ;;  %p679_p2 = scmp.ne.s32.totalorder %s528_s12, %s678_s13  ;;  %p684_p4 = scmp.lt.s32.totalorder %s678_s13, %s678_s13 }
  0x2b   :  { %v599_v11 = vpack.c.bf16 %v63_v8, %v60_v6  ;;  %v145_v12 = vsub.f32 %v57_v5, %v63_v8  ;;  %v127_v13 = vsub.f32 %v53_v7, %v126_v9 }
  0x2c   :  { %v139_v14 = vand.u32 4294901760, %v138_v10  ;;  %p685_p5 = por %p684_p4, %p683_p3 }
  0x2d   :  { %609 = vmatpush3.bf16.msra.mxu0 %v599_v11  ;;  %600 = vmatpush3.bf16.msra.mxu1 %v599_v11  ;;  %v128_v15 = vand.u32 4294901760, %v127_v13  ;;  %v146_v16 = vand.u32 4294901760, %v145_v12  ;;  %v605_v25 = vpack.c.bf16 %v145_v12, %v138_v10 }
  0x2e   :  { %601 = vmatprep.subr.bf16.mxu1 %v710_v0  ;;  %610 = vmatprep.subr.bf16.mxu0 %v710_v0  ;;  %v140_v17 = vsub.f32 %v138_v10, %v139_v14  ;;  %p686_p6 = pnand %p685_p5, %p679_p2 }
  0x2f   :  { %v129_v18 = vsub.f32 %v127_v13, %v128_v15  ;;  %v147_v19 = vsub.f32 %v145_v12, %v146_v16  ;;  %v611_v20 = vpack.c.bf16 %v146_v16, %v139_v14 }
  0x30   :  { %582 = vmatmul.mubr.f32.vlgmr.msra.gmra.mrb[0].mxu0 %v128_v15  ;;  %v141_v21 = vand.u32 4294901760, %v140_v17 }
  0x31   :  { %v130_v22 = vand.u32 4294901760, %v129_v18  ;;  %v148_v23 = vand.u32 4294901760, %v147_v19  ;;  %612 = vmatpush3.bf16.msra.mxu0 %v611_v20  ;;  %588 = vmatprep.mubr.msk.f32.mxu0 %vm711_vm0, %v712_v1 }
  0x32   :  { %613 = vmatprep.subr.bf16.mxu0 %v710_v0 }
  0x33   :  { %561 = vmatmul.mubr.f32.vlgmr.msra.gmra.mrb[0].mxu1 %v130_v22  ;;  %v602_v24 = vpack.c.bf16 %v148_v23, %v141_v21 }
  0x34   :  { %567 = vmatprep.mubr.msk.f32.mxu1 %vm711_vm0, %v712_v1 }
  0x35   :  { %603 = vmatpush3.bf16.msra.mxu1 %v602_v24 }
  0x36   :  { %604 = vmatprep.subr.bf16.mxu1 %v710_v0 }
  0x38   :  { %589 = vmatmul.mubr.f32.vlgmr.msra.gmra.mrb[0].mxu0 %v126_v9 }
  0x39   :  { %615 = vmatpush3.bf16.msra.mxu0 %v599_v11  ;;  %595 = vmatprep.mubr.msk.f32.mxu0 %vm711_vm0, %v712_v1 }
  0x3b   :  { %568 = vmatmul.mubr.f32.vlgmr.msra.gmra.mrb[0].mxu1 %v126_v9 }
  0x3c   :  { %606 = vmatpush3.bf16.msra.mxu1 %v605_v25  ;;  %574 = vmatprep.mubr.msk.f32.mxu1 %vm711_vm0, %v712_v1 }
  0x40   :  { %596 = vmatmul.mubr.f32.vlgmr.msra.gmra.mrb[0].mxu0 %v126_v9 }
  0x43   :  { %575 = vmatmul.mubr.f32.vlgmr.msra.gmra.mrb[0].mxu1 %v127_v13 }
 0x113   :  { %v514_v26 = vpop.f32.mrb[0].mxu0 }
 0x114   :  { %v597_v27 = vpop.f32.mrb[1].mxu0 }
 0x116   :  { %v289_v29 = vpop.f32.mrb[0].mxu1 }
 0x117   :  { %v616_v30 = vadd.f32 %v537_v28, %v289_v29  ;;  %v576_v31 = vpop.f32.mrb[1].mxu1 }
 0x119   :  { %v617_v32 = vadd.f32 %v616_v30, %v514_v26 }
 0x11b   :  { %v518_v33 = vmax.f32 %v617_v32, 0.0 }
 0x11d   :  { %520 = vst.msk [vmem:[#allocation7] sm:$0xff] %vm519_vm3, %v518_v33 }
 0x11e   :  { %689 = shalt.err (!%p686_p6)
}
 0x11f   :  { %s690_s2 = scalar_lea.hbm %s789_s3, 128 }
 0x120   :  { %p691_p7 = scmp.ne.s32.totalorder %s789_s3, %s690_s2  ;;  %p694_p8 = scmp.lt.u32.totalorder %s690_s2, %s789_s3 }
 0x122   :  { %p696_p9 = pnand %p694_p8, %p691_p7 }
 0x124   :  { %699 = shalt.err (!%p696_p9)
}
 0x125   :  { %530 = dma.vmem_to_hbm [thread:$0]  %s528_s12, 128, %s789_s3, [#allocation4]  }
 0x126   :  { %704 = dma.done.wait [#allocation4], 128  }
 0x127   :  { %705 = vsyncadd [#allocation4], 4294967168 }
 0x128   :  { %534 = vsyncpa [#allocation3], 1 }
 0x129   :  { %535 = vsyncpa [#allocation6], 1 }
 0x12a   :  { %536 = vsyncpa [#allocation4], 1 }

</bundles_post_ra>
